<compile_context>
chip_gen: v7x
topology: tpu7x:2x2x1
jax: 0.10.0
libtpu: 0.0.40
codegen_flags: <defaults>
</compile_context>

<pallas_src>
import jax
import jax.numpy as jnp
from jax.experimental import pallas as pl
from jax.experimental.pallas import tpu as pltpu


def _random_walk_kernel(x_ref, p_ref, o_ref):
    # x_ref: (TB, 1, 1, C)     last observed time step for this batch tile
    # p_ref: (1, C)            module parameter (contributes param*0 for NaN/Inf parity)
    # o_ref: (TB, pred_len*C)  lane-dense output slab for this batch tile
    C = x_ref.shape[-1]
    W = o_ref.shape[-1]  # == pred_len * C (static)
    # Cast to output dtype BEFORE replication so the slab is built in the narrow dtype.
    last = (x_ref[:, 0, 0, :] + p_ref[...] * 0).astype(o_ref.dtype)  # (TB, C)

    # Seed the first period, then double in place. `have` is always a multiple of C, so
    # the period-C pattern (row value at lane j == last[:, j % C]) is preserved, also
    # for the non-power-of-two tail copy. Each output lane is written exactly once;
    # re-reads come from the in-VMEM output buffer (no intermediate slabs).
    o_ref[:, :C] = last
    have = C
    while have * 2 <= W:  # static Python loop (trace-time ints)
        o_ref[:, have:2 * have] = o_ref[:, :have]
        have *= 2
    if have < W:
        o_ref[:, have:W] = o_ref[:, : W - have]
    # Sub-128-lane doubling offsets go through the XLU (2 units) which has slack vs the
    # single vst slot, so the kernel stays memory-bound even for small, non-divisor C.


def _vmem_capacity_bytes():
    try:
        return int(pltpu.get_tpu_info().vmem_capacity_bytes)
    except Exception:
        return 64 * 1024 * 1024  # conservative fallback (v7x per-TensorCore VMEM)


def _pick_tiling(B, C, pred_len, itemsize):
    vmem = _vmem_capacity_bytes()
    if vmem >= 96 * 1024 * 1024:          # v5e / v6e: 128 MiB physical VMEM
        budget = 40 * 1024 * 1024
        vmem_limit = 100 * 1024 * 1024
    else:                                  # v7x (64 MiB) or unknown
        budget = 20 * 1024 * 1024
        vmem_limit = 48 * 1024 * 1024
    # Double-buffered input + output blocks per batch row.
    per_row = 2 * itemsize * (C + pred_len * C)
    bt = max(1, budget // max(per_row, 1))
    # Prefer >= 4 grid steps when B allows: pipeline steady state (overlap writeback of
    # block i-1 with compute of block i) and work for both v7x TensorCores.
    target = max(1, pl.cdiv(B, 4))
    sub = max(8, 32 // itemsize)           # dtype-aware sublane multiple (f32:8, bf16:16, i8/fp8:32)
    if target >= sub:
        bt = min(bt, target)
    bt = min(bt, B)
    if sub <= bt < B:
        bt = (bt // sub) * sub             # keep non-full tiles sublane-aligned
    return max(1, bt), vmem_limit


def random_walk_forward(x, param, pred_len, *, batch_tile=None):
    """x: [B, seq_len, C]; param: [1, 1, C] -> [B, pred_len, C] (last step repeated)."""
    B, seq_len, C = x.shape
    dtype = x.dtype
    itemsize = jnp.dtype(dtype).itemsize
    W = pred_len * C

    auto_bt, vmem_limit = _pick_tiling(B, C, pred_len, itemsize)
    if batch_tile is None:
        batch_tile = auto_bt
    batch_tile = max(1, min(batch_tile, B))
    grid = (pl.cdiv(B, batch_tile),)

    # Free contiguous views: 4-D input so the "last time step" block satisfies the
    # (8,128) block rule; param reshaped/cast to (1, C) in the compute dtype so narrow
    # dtypes never promote the slab to f32.
    x4 = x.reshape(B, seq_len, 1, C)
    p2 = param.reshape(1, C).astype(dtype)

    out2d = pl.pallas_call(
        _random_walk_kernel,
        out_shape=jax.ShapeDtypeStruct((B, W), dtype),
        grid=grid,
        in_specs=[
            # Only DMA the last observed time step of each batch row.
            pl.BlockSpec((batch_tile, 1, 1, C), lambda b: (b, seq_len - 1, 0, 0)),
            pl.BlockSpec((1, C), lambda b: (0, 0)),
        ],
        out_specs=pl.BlockSpec((batch_tile, W), lambda b: (b, 0)),
        compiler_params=pltpu.CompilerParams(
            dimension_semantics=("parallel",),
            vmem_limit_bytes=vmem_limit,
        ),
        cost_estimate=pl.CostEstimate(
            flops=0,
            transcendentals=0,
            bytes_accessed=itemsize * (B * C + C + B * W),
        ),
    )(x4, p2)

    return out2d.reshape(B, pred_len, C)


if __name__ == "__main__":
    # Small shapes consistent with the module: batch=2, seq_len=8, pred_len=4, enc_in=4
    B, seq_len, pred_len, enc_in = 2, 8, 4, 4

    key = jax.random.PRNGKey(0)
    kx, kp = jax.random.split(key)
    x = jax.random.normal(kx, (B, seq_len, enc_in), dtype=jnp.float32)
    # torch.rand(1, 1, enc_in)-style init (uniform [0, 1)); numerically irrelevant
    # because the module only ever adds param * 0.
    param = jax.random.uniform(kp, (1, 1, enc_in), dtype=jnp.float32)

    out = random_walk_forward(x, param, pred_len)
    out = jax.block_until_ready(out)

    # Reference: last observed time step broadcast over the prediction horizon.
    ref = jnp.broadcast_to(x[:, seq_len - 1: seq_len, :], (B, pred_len, enc_in))
    assert out.shape == (B, pred_len, enc_in), out.shape
    assert jnp.allclose(out, ref), "mismatch vs reference"

    print("KERNEL_OK")
</pallas_src>

<mosaic_0001>
module attributes {stable_mosaic.version = 11 : i64} {
  func.func @_random_walk_kernel(%arg0: i32, %arg1: memref<2x1x1x4xf32, #tpu.memory_space<vmem>>, %arg2: memref<1x4xf32, #tpu.memory_space<vmem>>, %arg3: memref<2x16xf32, #tpu.memory_space<vmem>>) attributes {dimension_semantics = [#tpu.dimension_semantics<parallel>], iteration_bounds = array<i64: 1>, scalar_prefetch = 0 : i64, scratch_operands = 0 : i64, tpu.core_type = #tpu.core_type<tc>, window_params = [{transform_indices = @transform_0, window_bounds = array<i64: 2, 1, 1, 4>}, {pipeline_mode = #tpu.pipeline_mode<synchronous>, transform_indices = @transform_1, window_bounds = array<i64: 1, 4>}, {transform_indices = @transform_2, window_bounds = array<i64: 2, 16>}]} {
    %c0 = arith.constant 0 : index
    %c0_0 = arith.constant 0 : index
    %c0_1 = arith.constant 0 : index
    %c0_2 = arith.constant 0 : index
    %0 = vector.load %arg1[%c0, %c0_0, %c0_1, %c0_2] : memref<2x1x1x4xf32, #tpu.memory_space<vmem>>, vector<2x1x1x4xf32>
    %1 = vector.shape_cast %0 : vector<2x1x1x4xf32> to vector<2x4xf32>
    %c0_3 = arith.constant 0 : index
    %c0_4 = arith.constant 0 : index
    %2 = vector.load %arg2[%c0_3, %c0_4] : memref<1x4xf32, #tpu.memory_space<vmem>>, vector<1x4xf32>
    %cst = arith.constant 0.000000e+00 : f32
    %3 = vector.broadcast %cst : f32 to vector<1x4xf32>
    %4 = arith.mulf %2, %3 : vector<1x4xf32>
    %5 = vector.broadcast %4 : vector<1x4xf32> to vector<2x4xf32>
    %6 = arith.addf %1, %5 : vector<2x4xf32>
    %c0_5 = arith.constant 0 : index
    %c0_6 = arith.constant 0 : index
    %7 = vector.load %arg3[%c0_5, %c0_6] : memref<2x16xf32, #tpu.memory_space<vmem>>, vector<2x4xf32>
    tpu.vector_store %arg3[%c0_5, %c0_6], %6 {strides = array<i32>} : memref<2x16xf32, #tpu.memory_space<vmem>>, vector<2x4xf32>,
    %c0_7 = arith.constant 0 : index
    %c0_8 = arith.constant 0 : index
    %8 = vector.load %arg3[%c0_7, %c0_8] : memref<2x16xf32, #tpu.memory_space<vmem>>, vector<2x4xf32>
    %c0_9 = arith.constant 0 : index
    %c4 = arith.constant 4 : index
    %9 = vector.load %arg3[%c0_9, %c4] : memref<2x16xf32, #tpu.memory_space<vmem>>, vector<2x4xf32>
    tpu.vector_store %arg3[%c0_9, %c4], %8 {strides = array<i32>} : memref<2x16xf32, #tpu.memory_space<vmem>>, vector<2x4xf32>,
    %c0_10 = arith.constant 0 : index
    %c0_11 = arith.constant 0 : index
    %10 = vector.load %arg3[%c0_10, %c0_11] : memref<2x16xf32, #tpu.memory_space<vmem>>, vector<2x8xf32>
    %c0_12 = arith.constant 0 : index
    %c8 = arith.constant 8 : index
    %11 = vector.load %arg3[%c0_12, %c8] : memref<2x16xf32, #tpu.memory_space<vmem>>, vector<2x8xf32>
    tpu.vector_store %arg3[%c0_12, %c8], %10 {strides = array<i32>} : memref<2x16xf32, #tpu.memory_space<vmem>>, vector<2x8xf32>,
    return
  }
  func.func @transform_0(%arg0: i32) -> (i32, i32, i32, i32) {
    %c7_i32 = arith.constant 7 : i32
    %c0_i32 = arith.constant 0 : i32
    %c0_i32_0 = arith.constant 0 : i32
    %c0_i32_1 = arith.constant 0 : i32
    return %arg0, %c7_i32, %c0_i32, %c0_i32_0 : i32, i32, i32, i32
  }
  func.func @transform_1(%arg0: i32) -> (i32, i32) {
    %c0_i32 = arith.constant 0 : i32
    %c0_i32_0 = arith.constant 0 : i32
    %c0_i32_1 = arith.constant 0 : i32
    return %c0_i32, %c0_i32_0 : i32, i32
  }
  func.func @transform_2(%arg0: i32) -> (i32, i32) {
    %c0_i32 = arith.constant 0 : i32
    %c0_i32_0 = arith.constant 0 : i32
    return %arg0, %c0_i32 : i32, i32
  }
}

</mosaic_0001>

<bundles_post_ra>
// kernel: tpu_custom_call.1
= control target key start
LH: loop header
LB: loop body
LE: loop exit
PB: predicated region body
PF: predicated region fallthrough
CT: control target
= control target key end

     0   :  { %v55_v3 = vlaneseq  ;;  %v167_v6 = vmov 1966171168   ;;  %s207_s0 = inlined_call_operand.vmem [shape: f32[2,8,1,4], index: 0, kind: input, shape index: {}]   ;;  %s208_s1 = inlined_call_operand.vmem [shape: f32[1,4], index: 1, kind: input, shape index: {}]   ;;  %s209_s2 = inlined_call_operand.hbm [shape: f32[2,16], index: 2, kind: output, shape index: {}]  }
   0x1   :  { %v137_v0 = vld [vmem:[%s207_s0 + $0x7] sm:$0x1]  ;;  %v138_v1 = vld [vmem:[%s207_s0 + $0xf] sm:$0x1]  ;;  %v52_v2 = vld [vmem:[%s208_s1] sm:$0x1]  ;;  %v60_v7 = vunpack.c.l.s4 %v167_v6 }
   0x2   :  { %27 = vst [vmem:[#allocation2] sm:$0x1] %v137_v0  ;;  %29 = vst [vmem:[#allocation2 + $0x1] sm:$0x1] %v138_v1  ;;  %v53_v4 = vmul.f32 0.0, %v52_v2  ;;  %v56_v5 = vshrl.u32 %v55_v3, 7 }
   0x3   :  { %7 = vsyncpa [#allocation4], 0  ;;  %v61_v9 = vunpack.c.0.s8 %v60_v7  ;;  %vm103_vm0 = vcmask 25600   ;;  %s168_s0 = smov 4   ;;  %vm110_vm1 = vcmask 58400   ;;  %s169_s1 = smov 8  }
   0x4   :  { %v57_v8 = vsub.s32 0, %v56_v5  ;;  %s170_s15 = smov [#allocation3]   ;;  %vm117_vm2 = vcmask 123968  }
   0x5   :  { %v64_v11 = vsub.s32 %v61_v9, %v56_v5  ;;  %s125_s16 = sshll.u32 %s170_s15, 4  ;;  %s126_s16 = int_to_ptr.vmem [resolvable:$true] %s125_s16 }
   0x6   :  { %v58_v10 = vrot.slane %v53_v4, %v57_v8  ;;  %s143_s17 = scalar_lea.vmem %s126_s16, 32  ;;  %p148_p1 = scmp.lt.s32.totalorder %s126_s16, %s126_s16 }
   0x7   :  { %p144_p0 = scmp.ne.s32.totalorder %s126_s16, %s143_s17  ;;  %p149_p2 = scmp.lt.s32.totalorder %s143_s17, %s143_s17 }
   0x8   :  { %v65_v12 = vrot.slane %v58_v10, %v64_v11 }
   0x9   :  { %v50_v13 = vld [vmem:[#allocation2] sm:$0x1]  ;;  %v51_v16 = vld [vmem:[#allocation2 + $0x1] sm:$0x1]  ;;  %p150_p3 = por %p149_p2, %p148_p1 }
   0xa   :  { %v66_v14 = vcombine.high %v65_v12, %v65_v12  ;;  %v73_v15 = vrot.slane %v65_v12, %v64_v11 }
   0xb   :  { %p151_p4 = pnand %p150_p3, %p144_p0 }
   0xc   :  { %v80_v17 = vrot.slane %v66_v14, %v64_v11  ;;  %v83_v18 = vadd.f32 %v73_v15, %v50_v13 }
   0xe   :  { %v84_v19 = vadd.f32 %v80_v17, %v51_v16 }
  0x10   :  { %v87_v20 = vcombine.low %v83_v18, %v84_v19 }
  0x12   :  { %v94_v21 = vrot.slane %v87_v20, %v64_v11 }
  0x14   :  { %v101_v22 = vrot.slane %v94_v21, %v64_v11 }
  0x16   :  { %104 = vst.msk [vmem:[#allocation3] sm:$0x3] %vm103_vm0, %v101_v22 }
  0x1d   :  { %v105_v23 = vld [vmem:[#allocation3] sm:$0x3] }
  0x1e   :  { %107 = vrot.lane.b32.xlu0 %v105_v23, %s168_s0 }
  0x90   :  { %v108_v24 = vpop.permute.xlu0 %107 }
  0x91   :  { %111 = vst.msk [vmem:[#allocation3] sm:$0x3] %vm110_vm1, %v108_v24 }
  0x98   :  { %v112_v25 = vld [vmem:[#allocation3] sm:$0x3] }
  0x99   :  { %114 = vrot.lane.b32.xlu0 %v112_v25, %s169_s1 }
 0x10b   :  { %v115_v26 = vpop.permute.xlu0 %114 }
 0x10c   :  { %118 = vst.msk [vmem:[#allocation3] sm:$0x3] %vm117_vm2, %v115_v26 }
 0x10d   :  { %154 = shalt.err (!%p151_p4)
}
 0x10e   :  { %s155_s20 = scalar_lea.hbm %s209_s2, 32 }
 0x10f   :  { %p156_p5 = scmp.ne.s32.totalorder %s209_s2, %s155_s20  ;;  %p159_p6 = scmp.lt.u32.totalorder %s155_s20, %s209_s2 }
 0x111   :  { %p161_p7 = pnand %p159_p6, %p156_p5 }
 0x113   :  { %164 = shalt.err (!%p161_p7)
}
 0x114   :  { %128 = dma.vmem_to_hbm [thread:$0]  %s126_s16, 32, %s209_s2, [#allocation4]  }
 0x115   :  { %165 = dma.done.wait [#allocation4], 32  }
 0x116   :  { %166 = vsyncadd [#allocation4], 4294967264 }
 0x117   :  { %132 = vsyncpa [#allocation4], 1 }

</bundles_post_ra>
